<compile_context>
chip_gen: v6e
topology: v6e:2x2x1
jax: 0.10.0
libtpu: 0.0.40
codegen_flags: <defaults>
</compile_context>

<pallas_src>
import functools

import jax
import jax.numpy as jnp
from jax.experimental import pallas as pl
from jax.experimental.pallas import tpu as pltpu

LANE = 128  # vreg lane width; all channel dims are zero-padded to this.


def _round_up(x, m):
    return (x + m - 1) // m * m


def _pad2(x, rows, cols):
    return jnp.pad(x, ((0, rows - x.shape[0]), (0, cols - x.shape[1])))


def _sage_layer_kernel(a_ref, xk_ref, xi_ref, wl_ref, wr_ref, b_ref, o_ref,
                       acc_ref, *, apply_relu):
    """One SAGEConv layer, tiled over (row tile i, neighbor tile k).

    a_ref  : (tm, tk)   bf16  row-normalized adjacency tile A[i, k]
    xk_ref : (tk, 128)  bf16  neighbor-tile features (aggregation operand)
    xi_ref : (tm, 128)  bf16  row-tile features (root operand)
    wl_ref : (128, 128) f32   neighbor weight (zero padded)
    wr_ref : (128, 128) f32   root weight (zero padded)
    b_ref  : (1, 128)   f32   bias (zero padded)
    o_ref  : (tm, 128)        output row tile (lane-dense store)
    acc_ref: (tm, 128)  f32   VMEM accumulator for sum_k A[i,k] @ X[k]
    """
    k = pl.program_id(1)

    @pl.when(k == 0)
    def _():
        acc_ref[...] = jnp.zeros_like(acc_ref)

    # Dominant matmul: bf16 x bf16 on the MXU, f32 accumulation.
    acc_ref[...] += jnp.dot(a_ref[...], xk_ref[...],
                            preferred_element_type=jnp.float32)

    @pl.when(k == pl.num_programs(1) - 1)
    def _():
        out = (
            jnp.dot(acc_ref[...], wl_ref[...],
                    preferred_element_type=jnp.float32)
            + jnp.dot(xi_ref[...].astype(jnp.float32), wr_ref[...],
                      preferred_element_type=jnp.float32)
            + b_ref[...]
        )
        if apply_relu:
            out = jnp.maximum(out, 0.0)
        o_ref[...] = out.astype(o_ref.dtype)


def sage_layer(a_bf, x_bf, w_l, w_r, b, *, apply_relu, out_dtype,
               block_m=128, block_k=128):
    """One fused SAGEConv layer over a padded, bf16 dense mean-adjacency."""
    n_pad = a_bf.shape[0]
    assert n_pad % block_m == 0 and n_pad % block_k == 0
    grid = (n_pad // block_m, n_pad // block_k)
    kernel = functools.partial(_sage_layer_kernel, apply_relu=apply_relu)
    return pl.pallas_call(
        kernel,
        out_shape=jax.ShapeDtypeStruct((n_pad, LANE), out_dtype),
        grid_spec=pltpu.PrefetchScalarGridSpec(
            num_scalar_prefetch=0,
            grid=grid,
            in_specs=[
                pl.BlockSpec((block_m, block_k), lambda i, k: (i, k)),  # A
                pl.BlockSpec((block_k, LANE), lambda i, k: (k, 0)),     # X[k]
                pl.BlockSpec((block_m, LANE), lambda i, k: (i, 0)),     # X[i]
                pl.BlockSpec((LANE, LANE), lambda i, k: (0, 0)),        # W_l
                pl.BlockSpec((LANE, LANE), lambda i, k: (0, 0)),        # W_r
                pl.BlockSpec((1, LANE), lambda i, k: (0, 0)),           # b
            ],
            out_specs=pl.BlockSpec((block_m, LANE), lambda i, k: (i, 0)),
            scratch_shapes=[pltpu.VMEM((block_m, LANE), jnp.float32)],
        ),
        compiler_params=pltpu.CompilerParams(
            dimension_semantics=("parallel", "arbitrary"),
            vmem_limit_bytes=32 * 1024 * 1024,
        ),
    )(a_bf, x_bf, x_bf, w_l, w_r, b)


def build_mean_adjacency(edge_index, num_nodes):
    """Dense row-normalized adjacency: A[i, j] = 1/deg(i) for each edge j->i."""
    src = edge_index[0]
    dst = edge_index[1]
    a = jnp.zeros((num_nodes, num_nodes), jnp.float32)
    a = a.at[dst, src].add(1.0)
    deg = jnp.sum(a, axis=1, keepdims=True)
    return a / jnp.maximum(deg, 1.0)


def graphsage_forward(x, edge_index, params, *, block_m=128, block_k=128):
    n, _ = x.shape
    c_out = params["w2_l"].shape[1]
    n_pad = _round_up(n, max(block_m, block_k))

    # JAX glue: densify the graph once; bf16 the big streamed operands.
    a_bf = _pad2(build_mean_adjacency(edge_index, n),
                 n_pad, n_pad).astype(jnp.bfloat16)
    x_bf = _pad2(x, n_pad, LANE).astype(jnp.bfloat16)

    w1_l = _pad2(params["w1_l"], LANE, LANE)
    w1_r = _pad2(params["w1_r"], LANE, LANE)
    b1 = _pad2(params["b1"].reshape(1, -1), 1, LANE)
    w2_l = _pad2(params["w2_l"], LANE, LANE)
    w2_r = _pad2(params["w2_r"], LANE, LANE)
    b2 = _pad2(params["b2"].reshape(1, -1), 1, LANE)

    # Layer 1 emits bf16: it is the streamed aggregation operand of layer 2.
    h_bf = sage_layer(a_bf, x_bf, w1_l, w1_r, b1, apply_relu=True,
                      out_dtype=jnp.bfloat16,
                      block_m=block_m, block_k=block_k)
    out = sage_layer(a_bf, h_bf, w2_l, w2_r, b2, apply_relu=False,
                     out_dtype=jnp.float32,
                     block_m=block_m, block_k=block_k)
    return out[:n, :c_out]


def init_params(key, in_channels, hidden_channels, out_channels):
    ks = jax.random.split(key, 6)
    s1 = 1.0 / jnp.sqrt(jnp.float32(in_channels))
    s2 = 1.0 / jnp.sqrt(jnp.float32(hidden_channels))
    return {
        "w1_l": jax.random.uniform(ks[0], (in_channels, hidden_channels),
                                   jnp.float32, -s1, s1),
        "w1_r": jax.random.uniform(ks[1], (in_channels, hidden_channels),
                                   jnp.float32, -s1, s1),
        "b1": jax.random.uniform(ks[2], (hidden_channels,),
                                 jnp.float32, -s1, s1),
        "w2_l": jax.random.uniform(ks[3], (hidden_channels, out_channels),
                                   jnp.float32, -s2, s2),
        "w2_r": jax.random.uniform(ks[4], (hidden_channels, out_channels),
                                   jnp.float32, -s2, s2),
        "b2": jax.random.uniform(ks[5], (out_channels,),
                                 jnp.float32, -s2, s2),
    }


def _reference_forward(x, edge_index, params):
    """Pure-JAX reference mirroring the kernel's bf16 quantization of the
    streamed operands (A, x, h); all math in f32."""
    n = x.shape[0]
    with jax.default_matmul_precision("highest"):
        a = build_mean_adjacency(edge_index, n)
        aq = a.astype(jnp.bfloat16).astype(jnp.float32)
        xq = x.astype(jnp.bfloat16).astype(jnp.float32)
        h = (aq @ xq) @ params["w1_l"] + xq @ params["w1_r"] + params["b1"]
        h = jnp.maximum(h, 0.0)
        hq = h.astype(jnp.bfloat16).astype(jnp.float32)
        out = (aq @ hq) @ params["w2_l"] + hq @ params["w2_r"] + params["b2"]
    return out


if __name__ == "__main__":
    key = jax.random.PRNGKey(0)
    k_x, k_e, k_p = jax.random.split(key, 3)

    num_nodes = 256          # -> grid (2, 2) with 128x128 tiles
    num_edges = 1024
    in_channels = 16
    hidden_channels = 32
    out_channels = 8

    x = jax.random.normal(k_x, (num_nodes, in_channels), jnp.float32)
    edge_index = jax.random.randint(k_e, (2, num_edges), 0, num_nodes,
                                    dtype=jnp.int32)
    params = init_params(k_p, in_channels, hidden_channels, out_channels)

    out = graphsage_forward(x, edge_index, params)
    out = jax.block_until_ready(out)

    ref = _reference_forward(x, edge_index, params)
    assert out.shape == (num_nodes, out_channels)
    max_err = float(jnp.max(jnp.abs(out - ref)))
    assert jnp.allclose(out, ref, atol=2e-2, rtol=2e-2), max_err

    print("KERNEL_OK")
</pallas_src>

<mosaic_0001>
module attributes {stable_mosaic.version = 11 : i64} {
  func.func @_sage_layer_kernel(%arg0: i32, %arg1: i32, %arg2: memref<128x128xbf16, #tpu.memory_space<vmem>>, %arg3: memref<128x128xbf16, #tpu.memory_space<vmem>>, %arg4: memref<128x128xbf16, #tpu.memory_space<vmem>>, %arg5: memref<128x128xf32, #tpu.memory_space<vmem>>, %arg6: memref<128x128xf32, #tpu.memory_space<vmem>>, %arg7: memref<1x128xf32, #tpu.memory_space<vmem>>, %arg8: memref<128x128xbf16, #tpu.memory_space<vmem>>, %arg9: memref<128x128xf32, #tpu.memory_space<vmem>>) attributes {dimension_semantics = [#tpu.dimension_semantics<parallel>, #tpu.dimension_semantics<arbitrary>], iteration_bounds = array<i64: 2, 2>, scalar_prefetch = 0 : i64, scratch_operands = 1 : i64, tpu.core_type = #tpu.core_type<tc>, window_params = [{transform_indices = @transform_0, window_bounds = array<i64: 128, 128>}, {transform_indices = @transform_1, window_bounds = array<i64: 128, 128>}, {transform_indices = @transform_2, window_bounds = array<i64: 128, 128>}, {pipeline_mode = #tpu.pipeline_mode<synchronous>, transform_indices = @transform_3, window_bounds = array<i64: 128, 128>}, {pipeline_mode = #tpu.pipeline_mode<synchronous>, transform_indices = @transform_4, window_bounds = array<i64: 128, 128>}, {pipeline_mode = #tpu.pipeline_mode<synchronous>, transform_indices = @transform_5, window_bounds = array<i64: 1, 128>}, {transform_indices = @transform_6, window_bounds = array<i64: 128, 128>}]} {
    %c0_i32 = arith.constant 0 : i32
    %0 = arith.cmpi eq, %arg1, %c0_i32 : i32
    %1 = arith.extui %0 : i1 to i32
    %c0_i32_0 = arith.constant 0 : i32
    %2 = arith.cmpi ne, %1, %c0_i32_0 : i32
    scf.if %2 {
      %cst_9 = arith.constant 0.000000e+00 : f32
      %12 = vector.broadcast %cst_9 : f32 to vector<128x128xf32>
      %c0_10 = arith.constant 0 : index
      %c0_11 = arith.constant 0 : index
      %13 = vector.load %arg9[%c0_10, %c0_11] : memref<128x128xf32, #tpu.memory_space<vmem>>, vector<128x128xf32>
      tpu.vector_store %arg9[%c0_10, %c0_11], %12 {strides = array<i32>} : memref<128x128xf32, #tpu.memory_space<vmem>>, vector<128x128xf32>,
    } else {
    }
    %c0 = arith.constant 0 : index
    %c0_1 = arith.constant 0 : index
    %3 = vector.load %arg9[%c0, %c0_1] : memref<128x128xf32, #tpu.memory_space<vmem>>, vector<128x128xf32>
    %c0_2 = arith.constant 0 : index
    %c0_3 = arith.constant 0 : index
    %4 = vector.load %arg2[%c0_2, %c0_3] : memref<128x128xbf16, #tpu.memory_space<vmem>>, vector<128x128xbf16>
    %c0_4 = arith.constant 0 : index
    %c0_5 = arith.constant 0 : index
    %5 = vector.load %arg3[%c0_4, %c0_5] : memref<128x128xbf16, #tpu.memory_space<vmem>>, vector<128x128xbf16>
    %cst = arith.constant dense<0.000000e+00> : vector<128x128xf32>
    %6 = tpu.matmul %4, %5, %cst {dimension_numbers = #tpu.dot_dimension_numbers<[1], [0], [0], [1], [0, 0, 1, 1], [], []>} : vector<128x128xbf16>, vector<128x128xbf16>, vector<128x128xf32> -> vector<128x128xf32>
    %7 = arith.addf %3, %6 : vector<128x128xf32>
    %c0_6 = arith.constant 0 : index
    %c0_7 = arith.constant 0 : index
    %8 = vector.load %arg9[%c0_6, %c0_7] : memref<128x128xf32, #tpu.memory_space<vmem>>, vector<128x128xf32>
    tpu.vector_store %arg9[%c0_6, %c0_7], %7 {strides = array<i32>} : memref<128x128xf32, #tpu.memory_space<vmem>>, vector<128x128xf32>,
    %c1_i32 = arith.constant 1 : i32
    %9 = arith.cmpi eq, %arg1, %c1_i32 : i32
    %10 = arith.extui %9 : i1 to i32
    %c0_i32_8 = arith.constant 0 : i32
    %11 = arith.cmpi ne, %10, %c0_i32_8 : i32
    scf.if %11 {
      %c0_9 = arith.constant 0 : index
      %c0_10 = arith.constant 0 : index
      %12 = vector.load %arg9[%c0_9, %c0_10] : memref<128x128xf32, #tpu.memory_space<vmem>>, vector<128x128xf32>
      %c0_11 = arith.constant 0 : index
      %c0_12 = arith.constant 0 : index
      %13 = vector.load %arg5[%c0_11, %c0_12] : memref<128x128xf32, #tpu.memory_space<vmem>>, vector<128x128xf32>
      %cst_13 = arith.constant dense<0.000000e+00> : vector<128x128xf32>
      %14 = tpu.matmul %12, %13, %cst_13 {dimension_numbers = #tpu.dot_dimension_numbers<[1], [0], [0], [1], [0, 0, 1, 1], [], []>} : vector<128x128xf32>, vector<128x128xf32>, vector<128x128xf32> -> vector<128x128xf32>
      %c0_14 = arith.constant 0 : index
      %c0_15 = arith.constant 0 : index
      %15 = vector.load %arg4[%c0_14, %c0_15] : memref<128x128xbf16, #tpu.memory_space<vmem>>, vector<128x128xbf16>
      %16 = arith.extf %15 : vector<128x128xbf16> to vector<128x128xf32>
      %c0_16 = arith.constant 0 : index
      %c0_17 = arith.constant 0 : index
      %17 = vector.load %arg6[%c0_16, %c0_17] : memref<128x128xf32, #tpu.memory_space<vmem>>, vector<128x128xf32>
      %cst_18 = arith.constant dense<0.000000e+00> : vector<128x128xf32>
      %18 = tpu.matmul %16, %17, %cst_18 {dimension_numbers = #tpu.dot_dimension_numbers<[1], [0], [0], [1], [0, 0, 1, 1], [], []>} : vector<128x128xf32>, vector<128x128xf32>, vector<128x128xf32> -> vector<128x128xf32>
      %19 = arith.addf %14, %18 : vector<128x128xf32>
      %c0_19 = arith.constant 0 : index
      %c0_20 = arith.constant 0 : index
      %20 = vector.load %arg7[%c0_19, %c0_20] : memref<1x128xf32, #tpu.memory_space<vmem>>, vector<1x128xf32>
      %21 = vector.broadcast %20 : vector<1x128xf32> to vector<128x128xf32>
      %22 = arith.addf %19, %21 : vector<128x128xf32>
      %cst_21 = arith.constant 0.000000e+00 : f32
      %23 = vector.broadcast %cst_21 : f32 to vector<128x128xf32>
      %24 = arith.maximumf %22, %23 : vector<128x128xf32>
      %25 = arith.truncf %24 : vector<128x128xf32> to vector<128x128xbf16>
      %c0_22 = arith.constant 0 : index
      %c0_23 = arith.constant 0 : index
      %26 = vector.load %arg8[%c0_22, %c0_23] : memref<128x128xbf16, #tpu.memory_space<vmem>>, vector<128x128xbf16>
      tpu.vector_store %arg8[%c0_22, %c0_23], %25 {strides = array<i32>} : memref<128x128xbf16, #tpu.memory_space<vmem>>, vector<128x128xbf16>,
    } else {
    }
    return
  }
  func.func @transform_0(%arg0: i32, %arg1: i32) -> (i32, i32) {
    %c0_i32 = arith.constant 0 : i32
    return %arg0, %arg1 : i32, i32
  }
  func.func @transform_1(%arg0: i32, %arg1: i32) -> (i32, i32) {
    %c0_i32 = arith.constant 0 : i32
    %c0_i32_0 = arith.constant 0 : i32
    return %arg1, %c0_i32 : i32, i32
  }
  func.func @transform_2(%arg0: i32, %arg1: i32) -> (i32, i32) {
    %c0_i32 = arith.constant 0 : i32
    %c0_i32_0 = arith.constant 0 : i32
    return %arg0, %c0_i32 : i32, i32
  }
  func.func @transform_3(%arg0: i32, %arg1: i32) -> (i32, i32) {
    %c0_i32 = arith.constant 0 : i32
    %c0_i32_0 = arith.constant 0 : i32
    %c0_i32_1 = arith.constant 0 : i32
    return %c0_i32, %c0_i32_0 : i32, i32
  }
  func.func @transform_4(%arg0: i32, %arg1: i32) -> (i32, i32) {
    %c0_i32 = arith.constant 0 : i32
    %c0_i32_0 = arith.constant 0 : i32
    %c0_i32_1 = arith.constant 0 : i32
    return %c0_i32, %c0_i32_0 : i32, i32
  }
  func.func @transform_5(%arg0: i32, %arg1: i32) -> (i32, i32) {
    %c0_i32 = arith.constant 0 : i32
    %c0_i32_0 = arith.constant 0 : i32
    %c0_i32_1 = arith.constant 0 : i32
    return %c0_i32, %c0_i32_0 : i32, i32
  }
  func.func @transform_6(%arg0: i32, %arg1: i32) -> (i32, i32) {
    %c0_i32 = arith.constant 0 : i32
    %c0_i32_0 = arith.constant 0 : i32
    return %arg0, %c0_i32 : i32, i32
  }
}

</mosaic_0001>

<bundles_post_ra>
// kernel: tpu_custom_call.1
= control target key start
LH: loop header
LB: loop body
LE: loop exit
PB: predicated region body
PF: predicated region fallthrough
CT: control target
= control target key end

     0   :  { %s2712_s0 = inlined_call_operand.hbm [shape: bf16[256,256], index: 0, kind: input, shape index: {}]   ;;  %s2713_s1 = inlined_call_operand.hbm [shape: bf16[256,128], index: 1, kind: input, shape index: {}]   ;;  %s2714_s2 = inlined_call_operand.hbm [shape: bf16[256,128], index: 2, kind: input, shape index: {}]   ;;  %s2715_s3 = inlined_call_operand.hbm [shape: f32[128,128], index: 3, kind: input, shape index: {}]   ;;  %s2716_s4 = inlined_call_operand.hbm [shape: f32[128,128], index: 4, kind: input, shape index: {}]   ;;  %s2717_s5 = inlined_call_operand.vmem [shape: f32[1,128], index: 5, kind: input, shape index: {}]   ;;  %s2718_s6 = inlined_call_operand.hbm [shape: bf16[256,128], index: 6, kind: output, shape index: {}]  }
   0x1   :  { %2738 = sst [smem:[#allocation26_spill]] %s2712_s0 }
   0x2   :  { %2739 = sst [smem:[#allocation27_spill]] %s2713_s1 }
   0x3   :  { %2740 = sst [smem:[#allocation28_spill]] %s2714_s2 }
   0x4   :  { %2741 = sst [smem:[#allocation29_spill]] %s2715_s3 }
   0x5   :  { %2742 = sst [smem:[#allocation30_spill]] %s2716_s4 }
   0x6   :  { %2743 = sst [smem:[#allocation31_spill]] %s2717_s5 }
   0x7   :  { %2744 = sst [smem:[#allocation32_spill]] %s2718_s6 }
   0x8   :  { %11 = vsyncpa [#allocation4], 0 }
   0x9   :  { %13 = vsyncpa [#allocation4 + $0x1], 0 }
   0xa   :  { %14 = vsyncpa [#allocation7], 0 }
   0xb   :  { %16 = vsyncpa [#allocation7 + $0x1], 0 }
   0xc   :  { %17 = vsyncpa [#allocation10], 0 }
   0xd   :  { %18 = vsyncpa [#allocation5], 0 }
   0xe   :  { %20 = vsyncpa [#allocation5 + $0x1], 0  ;;  %s2276_s21 = smov 0   ;;  %s2278_s22 = smov 0  }
   0xf   :  { %s2280_s23 = smov 0   ;;  %s2282_s24 = smov 0  }
  0x10   :  { %s2284_s25 = smov 0   ;;  %s2286_s26 = smov 0  }
  0x11   :  { %s2288_s27 = smov 0   ;;  %s2290_s28 = smov 0  }
  0x12   :  { %s2292_s29 = smov 0   ;;  %s2294_s30 = smov 0  }
  0x13   :  { %s2296_s7 = smov 0   ;;  %s2298_s8 = smov 0  }
  0x14   :  { %s2300_s9 = smov 0   ;;  %s2302_s10 = smov 0  }
  0x15 LB: > { %2745 = sst [smem:[#allocation18_spill]] %s2190_s25  ;;  %s2347_s11 = sadd.s32 4294967295, %s2226_s10   ;;  %s2226_s10 = sphi %s2302_s10, %s26_s10   ;;  %s2222_s9 = sphi %s2300_s9, %s2811_s9   ;;  %s2218_s8 = sphi %s2298_s8, %s2810_s8   ;;  %s2214_s7 = sphi %s2296_s7, %s2809_s7   ;;  %s2210_s30 = sphi %s2294_s30, %s2808_s30   ;;  %s2206_s29 = sphi %s2292_s29, %s2807_s29   ;;  %s2202_s28 = sphi %s2290_s28, %s2806_s28   ;;  %s2198_s27 = sphi %s2288_s27, %s2805_s27   ;;  %s2194_s26 = sphi %s2286_s26, %s2804_s26   ;;  %s2190_s25 = sphi %s2284_s25, %s2803_s25   ;;  %s2186_s24 = sphi %s2282_s24, %s2796_s24   ;;  %s2182_s23 = sphi %s2280_s23, %s2802_s23   ;;  %s2178_s22 = sphi %s2278_s22, %s2801_s22   ;;  %s2174_s21 = sphi %s2276_s21, %s2800_s21  }
  0x16   : > { %2746 = sst [smem:[#allocation19_spill]] %s2210_s30  ;;  %p1347_p0 = scmp.ge.s32.totalorder %s2226_s10, 1 }
  0x17   : > { %2747 = sst [smem:[#allocation20_spill]] %s2214_s7  ;;  %p2730_p1 = scmp.eq.s32.totalorder %s2347_s11, 0 }
  0x18   : > { %p212_p3 = scmp.lt.s32.totalorder %s2226_s10, 5  ;;  %s2228_s13 = smov [#allocation9]  }
  0x19   : > { %s224_s14 = sshll.u32 %s2228_s13, 4  ;;  %s225_s14 = int_to_ptr.vmem [resolvable:$true] %s224_s14 }
  0x1a   : > { %p2353_p4 = pnand %p1347_p0, %p212_p3  ;;  %s1945_s16 = scalar_lea.vmem %s225_s14, 2048 }
  0x1b   : > { %p1946_p8 = scmp.ne.s32.totalorder %s225_s14, %s1945_s16  ;;  %p1953_p11 = scmp.lt.s32.totalorder %s225_s14, %s225_s14 }
  0x1c   : > { %s2748_s12 = scalar_select %p2353_p4, 1, 0 }
  0x1d   : > { %p1770_p5 = pneg %p2353_p4  ;;  %p1954_p12 = scmp.lt.s32.totalorder %s1945_s16, %s1945_s16 }
  0x1e   : > { %2749 = sst [smem:[#allocation21_spill]] %s2748_s12 }
  0x1f   : > { %p2361_p6 = pnand %p1770_p5, %p2730_p1  ;;  %p1955_p13 = por %p1954_p12, %p1953_p11 }
  0x21   : > { %p1936_p7 = pneg %p2361_p6 }
  0x23   : > { %p1948_p9 = pnand %p1946_p8, %p1936_p7 }
  0x25   : > { %p1949_p10 = pneg %p1948_p9 }
  0x27   : > { %p1956_p0 = pnand %p1955_p13, %p1949_p10 }
  0x29   : > { %1959 = shalt.err (!%p1956_p0)
}
  0x2a   : > { %s2720_s17 = smov 128   ;;  %s2722_s18 = smov 8  }
  0x2b   : > { %s2751_s3 = sld [smem:[#allocation29_spill]]  ;;  %s35_s13 = sadd.s32 1, %s2218_s8 }
  0x2c   : > { %s38_s16 = sadd.s32 1, %s2222_s9  ;;  %p36_p3 = scmp.ge.s32.totalorder %s35_s13, 2 }
  0x2d   : > { %p2731_p5 = scmp.eq.s32.totalorder %s2226_s10, 0  ;;  %s73_s6 = sadd.s32 1, %s2194_s26 }
  0x2e   : > { %p80_p8 = scmp.ne.s32.totalorder %s2194_s26, %s2190_s25  ;;  %s2813_s13 = smov (%p36_p3, %s35_s13), 0 }
  0x2f   : > { %2752 = sst [smem:[#allocation22_spill]] %s2813_s13  ;;  %s2815_s16 = smov (!%p36_p3, %s38_s16), %s2222_s9 }
  0x30   : > { %s43_s7 = ssub.s32 %s2218_s8, %s2813_s13  ;;  %p2391_p9 = por %p80_p8, %p2731_p5 }
  0x31   : > { %1773 = dma.hbm_to_vmem [thread:$0]  (!%p2361_p6), %s2751_s3, 2048, %s225_s14, [#allocation10], %s2720_s17, %s2720_s17, %s2722_s18  }
  0x32   : > { %p40_p10 = scmp.ge.s32.totalorder %s2815_s16, 2  ;;  %p71_p11 = scmp.eq.s32.totalorder %s43_s7, 0 }
  0x33   : > { %p86_p12 = scmp.ne.s32.totalorder %s2190_s25, %s2186_s24  ;;  %p2729_p13 = scmp.lt.s32.totalorder %s2226_s10, 4 }
  0x34   : > { %s2817_s16 = smov (%p40_p10, %s2815_s16), 0  ;;  %s277_s3 = sand.u32 1, %s2226_s10  }
  0x35   : > { %2754 = sst [smem:[#allocation23_spill]] %s2817_s16  ;;  %s2405_s20 = ssub.s32 %s2222_s9, %s2817_s16 }
  0x36   : > { %s2401_s19 = scalar_select %p71_p11, %s2194_s26, %s73_s6  }
  0x37   : > { %p2409_p0 = por %p86_p12, %p2730_p1  ;;  %s44_s18 = sor.u32 %s43_s7, %s2405_s20 }
  0x38   : > { %2755 = sst [smem:[#allocation24_spill]] %s2401_s19  ;;  %p2415_p8 = scmp.eq.s32.totalorder %s44_s18, 0 }
  0x39   : > { %s2756_s17 = scalar_select %p2409_p0, 1, 0 }
  0x3a   : > { %s279_s13 = sand.u32 1, %s2194_s26   ;;  %s1409_s6 = sshll.u32 %s2218_s8, 10 }
  0x3b   : > { %2757 = sst [smem:[#allocation25_spill]] %s2756_s17  ;;  %s1355_s5 = sshll.u32 %s279_s13, 6 }
  0x3c   : > { %s2759_s1 = sld [smem:[#allocation27_spill]]  ;;  %s281_s25 = scalar_lea.vmem [#allocation6], %s1355_s5 }
  0x3d   : > { %s288_s12 = sshll.u32 %s281_s25, 4  ;;  %p2429_p10 = pnand %p2729_p13, %p2391_p9  ;;  %s289_s12 = int_to_ptr.vmem [resolvable:$true] %s288_s12 }
  0x3e   : > { %s2231_s7 = smov [#allocation11]   ;;  %s2433_s2 = scalar_lea.sflag [#allocation7], %s277_s3 }
  0x3f   : > { %s237_s18 = sshll.u32 %s2231_s7, 4  ;;  %p1962_p11 = pneg %p2429_p10  ;;  %s238_s18 = int_to_ptr.vmem [resolvable:$true] %s237_s18 }
  0x40   : > { %s1973_s13 = scalar_lea.vmem %s289_s12, 1024  ;;  %s2232_s5 = smov [#allocation6]  }
  0x41   : > { %p1974_p12 = scmp.ne.s32.totalorder %s289_s12, %s1973_s13  ;;  %s1978_s25 = sshll.u32 %s2232_s5, 4  ;;  %s1979_s25 = int_to_ptr.vmem [resolvable:$false] %s1978_s25 }
  0x42   : > { %s287_s30 = scalar_lea.hbm %s2759_s1, %s1409_s6  ;;  %s1980_s16 = scalar_lea.vmem %s1979_s25, 2048 }
  0x43   : > { %p1976_p2 = pnand %p1974_p12, %p1962_p11  ;;  %p1981_p9 = scmp.lt.s32.totalorder %s289_s12, %s1979_s25 }
  0x44   : > { %p1982_p13 = scmp.lt.s32.totalorder %s1980_s16, %s1973_s13 }
  0x45   : > { %p1977_p3 = pneg %p1976_p2 }
  0x46   : > { %p1983_p1 = por %p1982_p13, %p1981_p9 }
  0x48   : > { %p1984_p5 = pnand %p1983_p1, %p1977_p3 }
  0x4a   : > { %1987 = shalt.err (!%p1984_p5)
}
  0x4b   : > { %s2732_s14 = smov 64   ;;  %s2734_s3 = smov 4  }
  0x4c   : > { %1783 = dma.hbm_to_vmem [thread:$0]  (!%p2429_p10), %s287_s30, 1024, %s289_s12, %s2433_s2, %s2732_s14, %s2732_s14, %s2734_s3  }
  0x4d   : > { %s1999_s19 = scalar_lea.vmem %s238_s18, 2048  ;;  %p2007_p13 = scmp.lt.s32.totalorder %s238_s18, %s238_s18 }
  0x4e   : > { %p2000_p2 = scmp.ne.s32.totalorder %s238_s18, %s1999_s19  ;;  %p2008_p1 = scmp.lt.s32.totalorder %s1999_s19, %s1999_s19 }
  0x50   : > { %p2002_p11 = pnand %p2000_p2, %p1936_p7  ;;  %p2009_p5 = por %p2008_p1, %p2007_p13 }
  0x52   : > { %p2003_p12 = pneg %p2002_p11 }
  0x54   : > { %p2010_p3 = pnand %p2009_p5, %p2003_p12 }
  0x56   : > { %2013 = shalt.err (!%p2010_p3)
}
  0x57   : > { %s2761_s6 = smov 8   ;;  %s2762_s17 = smov 128  }
  0x58   : > { %s2763_s4 = sld [smem:[#allocation30_spill]]  ;;  %s47_s30 = sadd.s32 1, %s2206_s29 }
  0x59   : > { %s2458_s12 = scalar_select %p2415_p8, %s2206_s29, %s47_s30  }
  0x5a   : > { %p54_p7 = scmp.ne.s32.totalorder %s2206_s29, %s2202_s28  ;;  %p60_p10 = scmp.ne.s32.totalorder %s2202_s28, %s2198_s27 }
  0x5b   : > { %s254_s15 = sand.u32 1, %s2206_s29   ;;  %s1408_s5 = sshll.u32 %s2222_s9, 5 }
  0x5c   : > { %p2764_p9 = scmp.eq.s32.totalorder %s2226_s10, 0  ;;  %p2765_p11 = scmp.eq.s32.totalorder %s2347_s11, 0 }
  0x5d   : > { %s1351_s16 = sshll.u32 %s254_s15, 6  ;;  %s264_s19 = sadd.s32 %s2218_s8, %s1408_s5 }
  0x5e   : > { %1776 = dma.hbm_to_vmem [thread:$0]  (!%p2361_p6), %s2763_s4, 2048, %s238_s18, [#allocation10], %s2762_s17, %s2762_s17, %s2761_s6  }
  0x5f   : > { %p56_p2 = por %p2764_p9, %p54_p7  ;;  %p2470_p12 = por %p2765_p11, %p60_p10 }
  0x60   : > { %s1354_s7 = sshll.u32 %s264_s19, 6  ;;  %s258_s18 = scalar_lea.vmem [#allocation3], %s1351_s16 }
  0x61   : > { %s267_s6 = sshll.u32 %s258_s18, 4  ;;  %s2767_s0 = sld [smem:[#allocation26_spill]]  ;;  %s268_s6 = int_to_ptr.vmem [resolvable:$true] %s267_s6 }
  0x62   : > { %p2768_p6 = scmp.lt.s32.totalorder %s2226_s10, 4  ;;  %s255_s14 = scalar_lea.sflag [#allocation4], %s254_s15 }
  0x63   : > { %s2027_s3 = scalar_lea.vmem %s268_s6, 1024  ;;  %s2235_s5 = smov [#allocation3]  }
  0x64   : > { %p2480_p8 = pnand %p2768_p6, %p56_p2  ;;  %p2028_p1 = scmp.ne.s32.totalorder %s268_s6, %s2027_s3 }
  0x65   : > { %s2032_s16 = sshll.u32 %s2235_s5, 4  ;;  %s2033_s16 = int_to_ptr.vmem [resolvable:$false] %s2032_s16 }
  0x66   : > { %p2016_p13 = pneg %p2480_p8  ;;  %s2034_s19 = scalar_lea.vmem %s2033_s16, 2048 }
  0x67   : > { %s266_s30 = scalar_lea.hbm %s2767_s0, %s1354_s7  ;;  %p2035_p7 = scmp.lt.s32.totalorder %s268_s6, %s2033_s16 }
  0x68   : > { %p2030_p5 = pnand %p2028_p1, %p2016_p13  ;;  %p2036_p10 = scmp.lt.s32.totalorder %s2034_s19, %s2027_s3 }
  0x6a   : > { %p2031_p3 = pneg %p2030_p5  ;;  %p2037_p9 = por %p2036_p10, %p2035_p7 }
  0x6c   : > { %p2038_p11 = pnand %p2037_p9, %p2031_p3 }
  0x6e   : > { %2041 = shalt.err (!%p2038_p11)
}
  0x6f   : > { %s2770_s7 = smov 4   ;;  %s2771_s18 = smov 64  }
  0x70   : > { %1780 = dma.hbm_to_vmem [thread:$0]  (!%p2480_p8), %s266_s30, 1024, %s268_s6, %s255_s14, %s2762_s17, %s2771_s18, %s2770_s7  }
  0x71   : > { %s1346_s3 = sadd.s32 4294967294, %s2226_s10   ;;  %s99_s15 = sadd.s32 1, %s2182_s23 }
  0x72   : > { %p2772_p2 = scmp.eq.s32.totalorder %s2405_s20, 0  ;;  %p106_p6 = scmp.ne.s32.totalorder %s2182_s23, %s2178_s22 }
  0x73   : > { %p112_p13 = scmp.ne.s32.totalorder %s2178_s22, %s2174_s21  ;;  %p205_p1 = scmp.eq.s32.totalorder %s1346_s3, 3 }
  0x74   : > { %s2496_s13 = scalar_select %p2772_p2, %s2182_s23, %s99_s15  }
  0x75   : > { %s300_s24 = sand.u32 1, %s2182_s23   ;;  %p2773_p5 = scmp.eq.s32.totalorder %s2226_s10, 0 }
  0x76   : > { %p2774_p7 = scmp.eq.s32.totalorder %s2347_s11, 0  ;;  %p2776_p9 = scmp.eq.s32.totalorder %s2347_s11, 3 }
  0x77   : > { %p108_p3 = por %p106_p6, %p2773_p5  ;;  %p2517_p8 = por %p205_p1, %p112_p13 }
  0x78   : > { %p2507_p10 = por %p112_p13, %p2774_p7  ;;  %p2513_p11 = por %p2776_p9, %p106_p6 }
  0x79   : > { %s2778_s20 = scalar_select %p2517_p8, 1, 0 }
  0x7a   : > { %s2775_s27 = scalar_select %p2507_p10, 1, 0 }
  0x7b   : > { %s2777_s14 = scalar_select %p2513_p11, 1, 0 }
  0x7c   : > { %s1358_s17 = sshll.u32 %s300_s24, 6  ;;  %s1410_s6 = sshll.u32 %s2222_s9, 10 }
  0x7d   : > { %s2779_s16 = sld [smem:[#allocation28_spill]]  ;;  %s302_s3 = scalar_lea.vmem [#allocation8], %s1358_s17 }
  0x7e   : > { %s309_s15 = sshll.u32 %s302_s3, 4  ;;  %p2780_p2 = scmp.lt.s32.totalorder %s2226_s10, 4  ;;  %s310_s15 = int_to_ptr.vmem [resolvable:$true] %s309_s15 }
  0x7f   : > { %s2055_s1 = scalar_lea.vmem %s310_s15, 1024  ;;  %s2236_s24 = smov [#allocation8]  }
  0x80   : > { %p2527_p5 = pnand %p2780_p2, %p108_p3  ;;  %p2056_p13 = scmp.ne.s32.totalorder %s310_s15, %s2055_s1 }
  0x81   : > { %s2060_s4 = sshll.u32 %s2236_s24, 4  ;;  %s2061_s4 = int_to_ptr.vmem [resolvable:$false] %s2060_s4 }
  0x82   : > { %p2044_p6 = pneg %p2527_p5  ;;  %s2062_s30 = scalar_lea.vmem %s2061_s4, 2048 }
  0x83   : > { %s308_s19 = scalar_lea.hbm %s2779_s16, %s1410_s6  ;;  %p2063_p9 = scmp.lt.s32.totalorder %s310_s15, %s2061_s4 }
  0x84   : > { %p2058_p1 = pnand %p2056_p13, %p2044_p6  ;;  %p2064_p8 = scmp.lt.s32.totalorder %s2062_s30, %s2055_s1 }
  0x86   : > { %p2059_p7 = pneg %p2058_p1  ;;  %p2065_p11 = por %p2064_p8, %p2063_p9 }
  0x88   : > { %p2066_p10 = pnand %p2065_p11, %p2059_p7 }
  0x8a   : > { %2069 = shalt.err (!%p2066_p10)
}
  0x8b   : > { %1786 = dma.hbm_to_vmem [thread:$0]  (!%p2527_p5), %s308_s19, 1024, %s310_s15, %s2433_s2, %s2771_s18, %s2771_s18, %s2770_s7  }
  0x8c   : > { %321 = sbr.rel (%p2353_p4) target bundleno = 722 (0x2d2), region = 44  ;;  %s323_s6 = sand.u32 (!%p2353_p4), 1, %s2202_s28  }
  0x8d   : > { %s1362_s5 = sshll.u32 (!%p2353_p4), %s323_s6, 6  ;;  %s324_s16 = scalar_lea.sflag (!%p2353_p4), [#allocation4], %s323_s6 }
  0x8e   : > { %s2542_s4 = scalar_lea.vmem (!%p2353_p4), [#allocation3], %s1362_s5 }
  0x91   : > { %2153 = dma.done.wait (%p2470_p12), %s324_s16, 1024  }
  0x92   : > { %2155 = vsyncadd (%p2470_p12), %s324_s16, 4294966272  ;;  %s2783_s0 = sld [smem:[#allocation18_spill]]  ;;  %s332_s3 = sand.u32 1, %s2347_s11  }
  0x93   : > { %s333_s18 = scalar_lea.sflag [#allocation7], %s332_s3 }
  0x98   : > { %s334_s2 = sand.u32 1, %s2783_s0  }
  0x99   : > { %s1363_s7 = sshll.u32 %s334_s2, 6 }
  0x9a   : > { %s2550_s19 = scalar_lea.vmem [#allocation6], %s1363_s7 }
  0x9b   : > { %2157 = dma.done.wait (%p2409_p0), %s333_s18, 1024  }
  0x9c   : > { %2159 = vsyncadd (%p2409_p0), %s333_s18, 4294966272  ;;  %s343_s15 = sand.u32 1, %s2178_s22   ;;  %p2785_p4 = scmp.ne.s32.totalorder %s2775_s27, 0 }
  0x9d   : > { %s1364_s25 = sshll.u32 %s343_s15, 6 }
  0x9e   : > { %s2559_s24 = scalar_lea.vmem [#allocation8], %s1364_s25 }
  0x9f   : > { %2161 = dma.done.wait (%p2785_p4), %s333_s18, 1024  }
  0xa0   : > { %2163 = vsyncadd (%p2785_p4), %s333_s18, 4294966272  ;;  %p2786_p12 = scmp.eq.s32.totalorder %s2347_s11, 0 }
  0xa2   : > { %2165 = dma.done.wait (%p2786_p12), [#allocation10], 4096   ;;  %p2787_p3 = pmov %p2786_p12 }
  0xa3   : > { %s2569_s30 = scalar_lea.vmem [#allocation12], %s1364_s25  ;;  %s2788_s17 = sld [smem:[#allocation19_spill]] }
  0xa4   : > { %2167 = vsyncadd (%p2787_p3), [#allocation10], 4294963200 }
  0xa9   : > { %p1368_p0 = scmp.ne.s32.totalorder %s2788_s17, 0 }
  0xab   : > { %400 = sbr.rel (%p1368_p0) target bundleno = 185 (0xb9), region = 68 }
  0xb0   : > { %v2237_v0 = vmov 0.0  }
  0xb1   : > { %401 = vst [vmem:[#allocation2 + $0x30] sm:$0xff] %v2237_v0  ;;  %402 = vst [vmem:[#allocation2] sm:$0xff] %v2237_v0 }
  0xb2   : > { %403 = vst [vmem:[#allocation2 + $0x58] sm:$0xff] %v2237_v0  ;;  %404 = vst [vmem:[#allocation2 + $0x18] sm:$0xff] %v2237_v0 }
  0xb3   : > { %405 = vst [vmem:[#allocation2 + $0x50] sm:$0xff] %v2237_v0  ;;  %406 = vst [vmem:[#allocation2 + $0x68] sm:$0xff] %v2237_v0 }
  0xb4   : > { %407 = vst [vmem:[#allocation2 + $0x8] sm:$0xff] %v2237_v0  ;;  %408 = vst [vmem:[#allocation2 + $0x48] sm:$0xff] %v2237_v0 }
  0xb5   : > { %409 = vst [vmem:[#allocation2 + $0x40] sm:$0xff] %v2237_v0  ;;  %410 = vst [vmem:[#allocation2 + $0x20] sm:$0xff] %v2237_v0 }
  0xb6   : > { %411 = vst [vmem:[#allocation2 + $0x10] sm:$0xff] %v2237_v0  ;;  %412 = vst [vmem:[#allocation2 + $0x38] sm:$0xff] %v2237_v0 }
  0xb7   : > { %413 = vst [vmem:[#allocation2 + $0x60] sm:$0xff] %v2237_v0  ;;  %414 = vst [vmem:[#allocation2 + $0x70] sm:$0xff] %v2237_v0 }
  0xb8   : > { %415 = vst [vmem:[#allocation2 + $0x78] sm:$0xff] %v2237_v0  ;;  %416 = vst [vmem:[#allocation2 + $0x28] sm:$0xff] %v2237_v0 }
  0xb9 PF: > { %v1918_v1 = vld [vmem:[%s2550_s19 + $0x38] sm:$0xff]   ;;  %v1919_v2 = vld [vmem:[%s2550_s19 + $0x30] sm:$0xff]   ;;  %v1920_v3 = vld [vmem:[%s2550_s19 + $0x28] sm:$0xff]   ;;  %s2789_s11 = sld [smem:[#allocation19_spill]] }
  0xba   : > { %1594 = vmatprep.subr.bf16.mxu0 %v1918_v1  ;;  %1738 = vmatprep.subr.bf16.mxu1 %v1918_v1  ;;  %v1921_v4 = vld [vmem:[%s2550_s19 + $0x20] sm:$0xff]   ;;  %v1922_v7 = vld [vmem:[%s2550_s19 + $0x18] sm:$0xff]   ;;  %v1923_v8 = vld [vmem:[%s2550_s19 + $0x10] sm:$0xff]  }
  0xbb   : > { %1595 = vmatpush3.bf16.msra.mxu0 %v1918_v1  ;;  %1746 = vmatpush3.bf16.msra.mxu1 %v1918_v1  ;;  %v1926_v5 = vld [vmem:[%s2542_s4] sm:$0xff]   ;;  %v1924_v9 = vld [vmem:[%s2550_s19 + $0x8] sm:$0xff]   ;;  %v1930_v13 = vld [vmem:[%s2542_s4 + $0x10] sm:$0xff]  }
  0xbc   : > { %1596 = vmatprep.subr.bf16.mxu0 %v1919_v2  ;;  %1739 = vmatprep.subr.bf16.mxu1 %v1919_v2  ;;  %v1927_v6 = vld [vmem:[%s2542_s4 + $0x20] sm:$0xff]   ;;  %v1928_v11 = vld [vmem:[%s2542_s4 + $0x8] sm:$0xff]   ;;  %v1931_v14 = vld [vmem:[%s2542_s4 + $0x30] sm:$0xff]  }
  0xbd   : > { %1610 = vmatprep.mubr.bf16.mxu0 %v1926_v5  ;;  %1618 = vmatprep.mubr.bf16.mxu1 %v1927_v6  ;;  %v1925_v10 = vld [vmem:[%s2550_s19] sm:$0xff]   ;;  %v1929_v12 = vld [vmem:[%s2542_s4 + $0x28] sm:$0xff]   ;;  %v1932_v15 = vld [vmem:[%s2542_s4 + $0x18] sm:$0xff]  }
  0xbe   : > { %v1933_v16 = vld [vmem:[%s2542_s4 + $0x38] sm:$0xff]   ;;  %v427_v18 = vld [vmem:[#allocation2 + $0x10] sm:$0xff]  ;;  %v425_v22 = vld [vmem:[#allocation2 + $0x40] sm:$0xff] }
  0xbf   : > { %1597 = vmatpush3.bf16.msra.mxu0 %v1919_v2  ;;  %1747 = vmatpush3.bf16.msra.mxu1 %v1919_v2  ;;  %v419_v17 = vld [vmem:[#allocation2 + $0x58] sm:$0xff]  ;;  %v417_v21 = vld [vmem:[#allocation2 + $0x30] sm:$0xff]  ;;  %v418_v33 = vld [vmem:[#allocation2] sm:$0xff]  ;;  %p1385_p10 = scmp.ne.s32.totalorder %s2789_s11, 1 }
  0xc0   : > { %1598 = vmatprep.subr.bf16.mxu0 %v1920_v3  ;;  %1740 = vmatprep.subr.bf16.mxu1 %v1920_v3  ;;  %v420_v27 = vld [vmem:[#allocation2 + $0x18] sm:$0xff]  ;;  %v426_v34 = vld [vmem:[#allocation2 + $0x20] sm:$0xff]  ;;  %v423_v39 = vld [vmem:[#allocation2 + $0x8] sm:$0xff]  ;;  %s2790_s5 = sld [smem:[#allocation31_spill]] (!%p1385_p10) }
  0xc1   : > { %v428_v28 = vld [vmem:[#allocation2 + $0x38] sm:$0xff]  ;;  %v421_v45 = vld [vmem:[#allocation2 + $0x50] sm:$0xff]  ;;  %v429_v46 = vld [vmem:[#allocation2 + $0x60] sm:$0xff] }
  0xc2   : > { %v431_v40 = vld [vmem:[#allocation2 + $0x78] sm:$0xff]  ;;  %v424_v51 = vld [vmem:[#allocation2 + $0x48] sm:$0xff]  ;;  %v430_v58 = vld [vmem:[#allocation2 + $0x70] sm:$0xff] }
  0xc3   : > { %1599 = vmatpush3.bf16.msra.mxu0 %v1920_v3  ;;  %1748 = vmatpush3.bf16.msra.mxu1 %v1920_v3  ;;  %v432_v52 = vld [vmem:[#allocation2 + $0x28] sm:$0xff] }
  0xc4   : > { %1600 = vmatprep.subr.bf16.mxu0 %v1921_v4  ;;  %1741 = vmatprep.subr.bf16.mxu1 %v1921_v4  ;;  %v422_v57 = vld [vmem:[#allocation2 + $0x68] sm:$0xff] }
  0xc7   : > { %1601 = vmatpush3.bf16.msra.mxu0 %v1921_v4  ;;  %1749 = vmatpush3.bf16.msra.mxu1 %v1921_v4 }
  0xc8   : > { %1602 = vmatprep.subr.bf16.mxu0 %v1922_v7  ;;  %1742 = vmatprep.subr.bf16.mxu1 %v1922_v7 }
  0xcb   : > { %1603 = vmatpush3.bf16.msra.mxu0 %v1922_v7  ;;  %1750 = vmatpush3.bf16.msra.mxu1 %v1922_v7 }
  0xcc   : > { %1604 = vmatprep.subr.bf16.mxu0 %v1923_v8  ;;  %1743 = vmatprep.subr.bf16.mxu1 %v1923_v8 }
  0xcf   : > { %1605 = vmatpush3.bf16.msra.mxu0 %v1923_v8  ;;  %1751 = vmatpush3.bf16.msra.mxu1 %v1923_v8 }
  0xd0   : > { %1606 = vmatprep.subr.bf16.mxu0 %v1924_v9  ;;  %1744 = vmatprep.subr.bf16.mxu1 %v1924_v9 }
  0xd3   : > { %1607 = vmatpush3.bf16.msra.mxu0 %v1924_v9  ;;  %1752 = vmatpush3.bf16.msra.mxu1 %v1924_v9 }
  0xd4   : > { %1608 = vmatprep.subr.bf16.mxu0 %v1925_v10  ;;  %1745 = vmatprep.subr.bf16.mxu1 %v1925_v10 }
  0xd7   : > { %1609 = vmatpush3.bf16.msra.mxu0 %v1925_v10  ;;  %1753 = vmatpush3.bf16.msra.mxu1 %v1925_v10 }
  0xda   : > { %1611 = vmatmul.mubr.bf16.vlgmr.msra.gmra.mxu0 %v1928_v11  ;;  %1619 = vmatmul.mubr.bf16.vlgmr.msra.gmra.mxu1 %v1929_v12 }
  0xdb   : > { %1614 = vmatprep.mubr.bf16.mxu0 %v1930_v13  ;;  %1622 = vmatprep.mubr.bf16.mxu1 %v1931_v14 }
  0xe2   : > { %1615 = vmatmul.mubr.bf16.gmra.mxu0 %v1932_v15  ;;  %1623 = vmatmul.mubr.bf16.gmra.mxu1 %v1933_v16 }
 0x19a   : > { %v1612_v19 = vpop.f32.mrf.mxu0  ;;  %v1620_v20 = vpop.f32.mrf.mxu1 }
 0x19b   : > { %v660_v23 = vadd.f32 %v1612_v19, %v419_v17  ;;  %v668_v24 = vadd.f32 %v1620_v20, %v427_v18 }
 0x19c   : > { %v595_v25 = vpop.f32.mrf.mxu0  ;;  %v627_v26 = vpop.f32.mrf.mxu1 }
 0x19d   : > { %676 = vst [vmem:[#allocation2 + $0x58] sm:$0xff] %v660_v23  ;;  %684 = vst [vmem:[#allocation2 + $0x10] sm:$0xff] %v668_v24  ;;  %v658_v29 = vadd.f32 %v595_v25, %v417_v21  ;;  %v666_v30 = vadd.f32 %v627_v26, %v425_v22 }
 0x19e   : > { %v1613_v31 = vpop.f32.mrf.mxu0  ;;  %v1621_v32 = vpop.f32.mrf.mxu1 }
 0x19f   : > { %674 = vst [vmem:[#allocation2 + $0x30] sm:$0xff] %v658_v29  ;;  %682 = vst [vmem:[#allocation2 + $0x40] sm:$0xff] %v666_v30  ;;  %v661_v35 = vadd.f32 %v1613_v31, %v420_v27  ;;  %v669_v36 = vadd.f32 %v1621_v32, %v428_v28 }
 0x1a0   : > { %v598_v37 = vpop.f32.mrf.mxu0  ;;  %v630_v38 = vpop.f32.mrf.mxu1 }
 0x1a1   : > { %677 = vst [vmem:[#allocation2 + $0x18] sm:$0xff] %v661_v35  ;;  %685 = vst [vmem:[#allocation2 + $0x38] sm:$0xff] %v669_v36  ;;  %v659_v41 = vadd.f32 %v598_v37, %v418_v33  ;;  %v667_v42 = vadd.f32 %v630_v38, %v426_v34 }
 0x1a2   : > { %v1616_v43 = vpop.f32.mrf.mxu0  ;;  %v1624_v44 = vpop.f32.mrf.mxu1 }
 0x1a3   : > { %675 = vst [vmem:[#allocation2] sm:$0xff] %v659_v41  ;;  %683 = vst [vmem:[#allocation2 + $0x20] sm:$0xff] %v667_v42  ;;  %v664_v47 = vadd.f32 %v1616_v43, %v423_v39  ;;  %v672_v48 = vadd.f32 %v1624_v44, %v431_v40 }
 0x1a4   : > { %v611_v49 = vpop.f32.mrf.mxu0  ;;  %v643_v50 = vpop.f32.mrf.mxu1 }
 0x1a5   : > { %680 = vst [vmem:[#allocation2 + $0x8] sm:$0xff] %v664_v47  ;;  %688 = vst [vmem:[#allocation2 + $0x78] sm:$0xff] %v672_v48  ;;  %v662_v53 = vadd.f32 %v611_v49, %v421_v45  ;;  %v670_v54 = vadd.f32 %v643_v50, %v429_v46 }
 0x1a6   : > { %v1617_v55 = vpop.f32.mrf.mxu0  ;;  %v1625_v56 = vpop.f32.mrf.mxu1 }
 0x1a7   : > { %678 = vst [vmem:[#allocation2 + $0x50] sm:$0xff] %v662_v53  ;;  %686 = vst [vmem:[#allocation2 + $0x60] sm:$0xff] %v670_v54  ;;  %v665_v59 = vadd.f32 %v1617_v55, %v424_v51  ;;  %v673_v60 = vadd.f32 %v1625_v56, %v432_v52  ;;  %693 = sbr.rel (%p1385_p10) target bundleno = 695 (0x2b7), region = 72 }
 0x1a8   : > { %v614_v61 = vpop.f32.mrf.mxu0  ;;  %v646_v62 = vpop.f32.mrf.mxu1 }
 0x1a9   : > { %681 = vst [vmem:[#allocation2 + $0x48] sm:$0xff] %v665_v59  ;;  %689 = vst [vmem:[#allocation2 + $0x28] sm:$0xff] %v673_v60  ;;  %v663_v63 = vadd.f32 %v614_v61, %v422_v57  ;;  %v671_v0 = vadd.f32 %v646_v62, %v430_v58 }
 0x1ab   : > { %679 = vst [vmem:[#allocation2 + $0x68] sm:$0xff] %v663_v63  ;;  %687 = vst [vmem:[#allocation2 + $0x70] sm:$0xff] %v671_v0 }
 0x1ac   : > { %v773_v1 = vld [vmem:[#allocation11 + $0x78] sm:$0xff]  ;;  %v772_v3 = vld [vmem:[#allocation11 + $0x70] sm:$0xff]  ;;  %v771_v5 = vld [vmem:[#allocation11 + $0x68] sm:$0xff] }
 0x1ad   : > { %v725_v2 = vld [vmem:[#allocation9 + $0x78] sm:$0xff]  ;;  %1626 = vmatprep.subr.mxu0 %v773_v1  ;;  %v724_v4 = vld [vmem:[#allocation9 + $0x70] sm:$0xff]  ;;  %v723_v6 = vld [vmem:[#allocation9 + $0x68] sm:$0xff] }
 0x1ae   : > { %1682 = vmatprep.subr.mxu1 %v725_v2  ;;  %1627 = vmatpush3.msra.mxu0 %v773_v1  ;;  %v770_v7 = vld [vmem:[#allocation11 + $0x60] sm:$0xff]  ;;  %v769_v9 = vld [vmem:[#allocation11 + $0x58] sm:$0xff]  ;;  %v768_v11 = vld [vmem:[#allocation11 + $0x50] sm:$0xff] }
 0x1af   : > { %1683 = vmatpush3.msra.mxu1 %v725_v2  ;;  %1628 = vmatprep.subr.mxu0 %v772_v3  ;;  %v722_v8 = vld [vmem:[#allocation9 + $0x60] sm:$0xff]  ;;  %v721_v10 = vld [vmem:[#allocation9 + $0x58] sm:$0xff]  ;;  %v720_v12 = vld [vmem:[#allocation9 + $0x50] sm:$0xff] }
 0x1b0   : > { %1684 = vmatprep.subr.mxu1 %v724_v4  ;;  %1629 = vmatpush3.msra.mxu0 %v772_v3  ;;  %v767_v13 = vld [vmem:[#allocation11 + $0x48] sm:$0xff]  ;;  %v766_v15 = vld [vmem:[#allocation11 + $0x40] sm:$0xff]  ;;  %v765_v17 = vld [vmem:[#allocation11 + $0x38] sm:$0xff] }
 0x1b1   : > { %1685 = vmatpush3.msra.mxu1 %v724_v4  ;;  %1630 = vmatprep.subr.mxu0 %v771_v5  ;;  %v719_v14 = vld [vmem:[#allocation9 + $0x48] sm:$0xff]  ;;  %v718_v16 = vld [vmem:[#allocation9 + $0x40] sm:$0xff]  ;;  %v717_v18 = vld [vmem:[#allocation9 + $0x38] sm:$0xff] }
 0x1b2   : > { %1686 = vmatprep.subr.mxu1 %v723_v6  ;;  %1631 = vmatpush3.msra.mxu0 %v771_v5  ;;  %v764_v19 = vld [vmem:[#allocation11 + $0x30] sm:$0xff]  ;;  %v763_v21 = vld [vmem:[#allocation11 + $0x28] sm:$0xff]  ;;  %v762_v23 = vld [vmem:[#allocation11 + $0x20] sm:$0xff] }
 0x1b3   : > { %1687 = vmatpush3.msra.mxu1 %v723_v6  ;;  %1632 = vmatprep.subr.mxu0 %v770_v7  ;;  %v716_v20 = vld [vmem:[#allocation9 + $0x30] sm:$0xff]  ;;  %v715_v22 = vld [vmem:[#allocation9 + $0x28] sm:$0xff]  ;;  %v714_v24 = vld [vmem:[#allocation9 + $0x20] sm:$0xff] }
 0x1b4   : > { %1688 = vmatprep.subr.mxu1 %v722_v8  ;;  %1633 = vmatpush3.msra.mxu0 %v770_v7  ;;  %v761_v25 = vld [vmem:[#allocation11 + $0x18] sm:$0xff]  ;;  %v760_v27 = vld [vmem:[#allocation11 + $0x10] sm:$0xff]  ;;  %v1429_v29 = vld [vmem:[%s2559_s24] sm:$0xff]  }
 0x1b5   : > { %1689 = vmatpush3.msra.mxu1 %v722_v8  ;;  %1634 = vmatprep.subr.mxu0 %v769_v9  ;;  %v713_v26 = vld [vmem:[#allocation9 + $0x18] sm:$0xff]  ;;  %v712_v28 = vld [vmem:[#allocation9 + $0x10] sm:$0xff]  ;;  %v759_v30 = vld [vmem:[#allocation11 + $0x8] sm:$0xff]  ;;  %v1430_v34 = vunpack.c.l.bf16 %v1429_v29  ;;  %v1431_v36 = vunpack.c.h.bf16 %v1429_v29 }
 0x1b6   : > { %1690 = vmatprep.subr.mxu1 %v721_v10  ;;  %1635 = vmatpush3.msra.mxu0 %v769_v9  ;;  %v711_v31 = vld [vmem:[#allocation9 + $0x8] sm:$0xff]  ;;  %v758_v32 = vld [vmem:[#allocation11] sm:$0xff]  ;;  %v694_v37 = vld [vmem:[#allocation2 + $0x30] sm:$0xff] }
 0x1b7   : > { %1691 = vmatpush3.msra.mxu1 %v721_v10  ;;  %1636 = vmatprep.subr.mxu0 %v768_v11  ;;  %v710_v33 = vld [vmem:[#allocation9] sm:$0xff]  ;;  %v1500_v35 = vld [vmem:[%s2559_s24 + $0x8] sm:$0xff]   ;;  %v696_v40 = vld [vmem:[#allocation2 + $0x58] sm:$0xff] }
 0x1b8   : > { %1692 = vmatprep.subr.mxu1 %v720_v12  ;;  %1637 = vmatpush3.msra.mxu0 %v768_v11  ;;  %v695_v38 = vld [vmem:[#allocation2] sm:$0xff]  ;;  %v1434_v39 = vunpack.c.l.bf16 %v1500_v35  ;;  %v1501_v41 = vld [vmem:[%s2559_s24 + $0x10] sm:$0xff]   ;;  %v1435_v42 = vunpack.c.h.bf16 %v1500_v35  ;;  %v697_v43 = vld [vmem:[#allocation2 + $0x18] sm:$0xff] }
 0x1b9   : > { %1693 = vmatpush3.msra.mxu1 %v720_v12  ;;  %1638 = vmatprep.subr.mxu0 %v767_v13  ;;  %v1438_v44 = vunpack.c.l.bf16 %v1501_v41  ;;  %v698_v45 = vld [vmem:[#allocation2 + $0x50] sm:$0xff]  ;;  %v1502_v46 = vld [vmem:[%s2559_s24 + $0x18] sm:$0xff]   ;;  %v1439_v47 = vunpack.c.h.bf16 %v1501_v41  ;;  %v699_v48 = vld [vmem:[#allocation2 + $0x68] sm:$0xff] }
 0x1ba   : > { %1694 = vmatprep.subr.mxu1 %v719_v14  ;;  %1639 = vmatpush3.msra.mxu0 %v767_v13  ;;  %v1442_v49 = vunpack.c.l.bf16 %v1502_v46  ;;  %v700_v50 = vld [vmem:[#allocation2 + $0x8] sm:$0xff]  ;;  %v1503_v51 = vld [vmem:[%s2559_s24 + $0x20] sm:$0xff]   ;;  %v1443_v52 = vunpack.c.h.bf16 %v1502_v46  ;;  %v704_v60 = vld [vmem:[#allocation2 + $0x10] sm:$0xff] }
 0x1bb   : > { %1695 = vmatpush3.msra.mxu1 %v719_v14  ;;  %1640 = vmatprep.subr.mxu0 %v766_v15  ;;  %v701_v53 = vld [vmem:[#allocation2 + $0x48] sm:$0xff]  ;;  %v1446_v54 = vunpack.c.l.bf16 %v1503_v51  ;;  %v702_v55 = vld [vmem:[#allocation2 + $0x40] sm:$0xff]  ;;  %v1447_v57 = vunpack.c.h.bf16 %v1503_v51  ;;  %v1505_v61 = vld [vmem:[%s2559_s24 + $0x30] sm:$0xff]  }
 0x1bc   : > { %1696 = vmatprep.subr.mxu1 %v718_v16  ;;  %1641 = vmatpush3.msra.mxu0 %v766_v15  ;;  %v1504_v56 = vld [vmem:[%s2559_s24 + $0x28] sm:$0xff]   ;;  %v703_v58 = vld [vmem:[#allocation2 + $0x20] sm:$0xff]  ;;  %v705_v63 = vld [vmem:[#allocation2 + $0x38] sm:$0xff]  ;;  %v1454_v0 = vunpack.c.l.bf16 %v1505_v61  ;;  %v1455_v3 = vunpack.c.h.bf16 %v1505_v61 }
 0x1bd   : > { %1697 = vmatpush3.msra.mxu1 %v718_v16  ;;  %1642 = vmatprep.subr.mxu0 %v765_v17  ;;  %v1450_v59 = vunpack.c.l.bf16 %v1504_v56  ;;  %v1451_v62 = vunpack.c.h.bf16 %v1504_v56  ;;  %v706_v1 = vld [vmem:[#allocation2 + $0x60] sm:$0xff]  ;;  %v1506_v2 = vld [vmem:[%s2559_s24 + $0x38] sm:$0xff]   ;;  %v707_v4 = vld [vmem:[#allocation2 + $0x70] sm:$0xff] }
 0x1be   : > { %1698 = vmatprep.subr.mxu1 %v717_v18  ;;  %1643 = vmatpush3.msra.mxu0 %v765_v17  ;;  %v1458_v5 = vunpack.c.l.bf16 %v1506_v2  ;;  %v708_v6 = vld [vmem:[#allocation2 + $0x78] sm:$0xff]  ;;  %v1459_v7 = vunpack.c.h.bf16 %v1506_v2  ;;  %v709_v8 = vld [vmem:[#allocation2 + $0x28] sm:$0xff]  ;;  %v2600_v11 = vld [vmem:[%s2790_s5] ss:$0 sm:$0xff] }
 0x1bf   : > { %1699 = vmatpush3.msra.mxu1 %v717_v18  ;;  %1644 = vmatprep.subr.mxu0 %v764_v19 }
 0x1c0   : > { %1700 = vmatprep.subr.mxu1 %v716_v20  ;;  %1645 = vmatpush3.msra.mxu0 %v764_v19 }
 0x1c1   : > { %1701 = vmatpush3.msra.mxu1 %v716_v20  ;;  %1646 = vmatprep.subr.mxu0 %v763_v21 }
 0x1c2   : > { %1702 = vmatprep.subr.mxu1 %v715_v22  ;;  %1647 = vmatpush3.msra.mxu0 %v763_v21 }
 0x1c3   : > { %1703 = vmatpush3.msra.mxu1 %v715_v22  ;;  %1648 = vmatprep.subr.mxu0 %v762_v23 }
 0x1c4   : > { %1704 = vmatprep.subr.mxu1 %v714_v24  ;;  %1649 = vmatpush3.msra.mxu0 %v762_v23 }
 0x1c5   : > { %1705 = vmatpush3.msra.mxu1 %v714_v24  ;;  %1650 = vmatprep.subr.mxu0 %v761_v25 }
 0x1c6   : > { %1706 = vmatprep.subr.mxu1 %v713_v26  ;;  %1651 = vmatpush3.msra.mxu0 %v761_v25 }
 0x1c7   : > { %1707 = vmatpush3.msra.mxu1 %v713_v26  ;;  %1652 = vmatprep.subr.mxu0 %v760_v27 }
 0x1c8   : > { %1708 = vmatprep.subr.mxu1 %v712_v28  ;;  %1653 = vmatpush3.msra.mxu0 %v760_v27 }
 0x1c9   : > { %1709 = vmatpush3.msra.mxu1 %v712_v28  ;;  %1654 = vmatprep.subr.mxu0 %v759_v30 }
 0x1ca   : > { %1710 = vmatprep.subr.mxu1 %v711_v31  ;;  %1655 = vmatpush3.msra.mxu0 %v759_v30 }
 0x1cb   : > { %1711 = vmatpush3.msra.mxu1 %v711_v31  ;;  %1656 = vmatprep.subr.mxu0 %v758_v32 }
 0x1cc   : > { %1712 = vmatprep.subr.mxu1 %v710_v33  ;;  %1657 = vmatpush3.msra.mxu0 %v758_v32 }
 0x1cd   : > { %1658 = vmatprep.mubr.f32.mxu0 %v1430_v34  ;;  %1713 = vmatpush3.msra.mxu1 %v710_v33 }
 0x1ce   : > { %1714 = vmatprep.mubr.f32.mxu1 %v694_v37  ;;  %1659 = vmatmul.mubr.f32.vlgmr.msra.gmra.mxu0 %v1431_v36 }
 0x1cf   : > { %1715 = vmatmul.mubr.f32.vlgmr.msra.gmra.mxu1 %v695_v38  ;;  %1661 = vmatprep.mubr.f32.mxu0 %v1434_v39 }
 0x1d0   : > { %1717 = vmatprep.mubr.f32.mxu1 %v696_v40 }
 0x1d2   : > { %1662 = vmatmul.mubr.f32.gmra.mxu0 %v1435_v42 }
 0x1d3   : > { %1718 = vmatmul.mubr.f32.gmra.mxu1 %v697_v43  ;;  %1664 = vmatprep.mubr.f32.mxu0 %v1438_v44 }
 0x1d4   : > { %1720 = vmatprep.mubr.f32.mxu1 %v698_v45 }
 0x1d6   : > { %1665 = vmatmul.mubr.f32.gmra.mxu0 %v1439_v47 }
 0x1d7   : > { %1721 = vmatmul.mubr.f32.gmra.mxu1 %v699_v48  ;;  %1667 = vmatprep.mubr.f32.mxu0 %v1442_v49 }
 0x1d8   : > { %1723 = vmatprep.mubr.f32.mxu1 %v700_v50 }
 0x1da   : > { %1668 = vmatmul.mubr.f32.gmra.mxu0 %v1443_v52 }
 0x1db   : > { %1724 = vmatmul.mubr.f32.gmra.mxu1 %v701_v53  ;;  %1670 = vmatprep.mubr.f32.mxu0 %v1446_v54 }
 0x1dc   : > { %1726 = vmatprep.mubr.f32.mxu1 %v702_v55 }
 0x1de   : > { %1671 = vmatmul.mubr.f32.gmra.mxu0 %v1447_v57 }
 0x1df   : > { %1727 = vmatmul.mubr.f32.gmra.mxu1 %v703_v58  ;;  %1673 = vmatprep.mubr.f32.mxu0 %v1450_v59 }
 0x1e0   : > { %1729 = vmatprep.mubr.f32.mxu1 %v704_v60 }
 0x1e2   : > { %1674 = vmatmul.mubr.f32.gmra.mxu0 %v1451_v62 }
 0x1e3   : > { %1730 = vmatmul.mubr.f32.gmra.mxu1 %v705_v63  ;;  %1676 = vmatprep.mubr.f32.mxu0 %v1454_v0 }
 0x1e4   : > { %1732 = vmatprep.mubr.f32.mxu1 %v706_v1 }
 0x1e6   : > { %1677 = vmatmul.mubr.f32.gmra.mxu0 %v1455_v3 }
 0x1e7   : > { %1733 = vmatmul.mubr.f32.gmra.mxu1 %v707_v4  ;;  %1679 = vmatprep.mubr.f32.mxu0 %v1458_v5 }
 0x1e8   : > { %1735 = vmatprep.mubr.f32.mxu1 %v708_v6 }
 0x1ea   : > { %1680 = vmatmul.mubr.f32.gmra.mxu0 %v1459_v7 }
 0x1eb   : > { %1736 = vmatmul.mubr.f32.gmra.mxu1 %v709_v8 }
 0x28e   : > { %v1660_v9 = vpop.f32.mrf.mxu0 }
 0x28f   : > { %v1716_v10 = vpop.f32.mrf.mxu1 }
 0x290   : > { %v991_v12 = vadd.f32 %v1716_v10, %v1660_v9  ;;  %v840_v13 = vpop.f32.mrf.mxu0 }
 0x291   : > { %v985_v14 = vpop.f32.mrf.mxu1 }
 0x292   : > { %v1072_v15 = vadd.f32 %v2600_v11, %v991_v12  ;;  %v986_v16 = vadd.f32 %v985_v14, %v840_v13  ;;  %v1663_v17 = vpop.f32.mrf.mxu0 }
 0x293   : > { %v1719_v18 = vpop.f32.mrf.mxu1 }
 0x294   : > { %v1071_v19 = vadd.f32 %v2600_v11, %v986_v16  ;;  %v1001_v20 = vadd.f32 %v1719_v18, %v1663_v17  ;;  %v850_v21 = vpop.f32.mrf.mxu0  ;;  %v1088_v23 = vmax.f32 %v1072_v15, 0.0 }
 0x295   : > { %v995_v22 = vpop.f32.mrf.mxu1 }
 0x296   : > { %v1087_v24 = vmax.f32 %v1071_v19, 0.0  ;;  %v1074_v25 = vadd.f32 %v2600_v11, %v1001_v20  ;;  %v996_v26 = vadd.f32 %v995_v22, %v850_v21  ;;  %v1666_v27 = vpop.f32.mrf.mxu0 }
 0x297   : > { %v1722_v28 = vpop.f32.mrf.mxu1 }
 0x298   : > { %v1463_v29 = vpack.c.bf16 %v1088_v23, %v1087_v24  ;;  %v1073_v30 = vadd.f32 %v2600_v11, %v996_v26  ;;  %v1011_v31 = vadd.f32 %v1722_v28, %v1666_v27  ;;  %v860_v32 = vpop.f32.mrf.mxu0  ;;  %v1090_v34 = vmax.f32 %v1074_v25, 0.0 }
 0x299   : > { %v1005_v33 = vpop.f32.mrf.mxu1 }
 0x29a   : > { %1464 = vst [vmem:[%s2569_s30] sm:$0xff] %v1463_v29   ;;  %v1089_v35 = vmax.f32 %v1073_v30, 0.0  ;;  %v1076_v36 = vadd.f32 %v2600_v11, %v1011_v31  ;;  %v1006_v37 = vadd.f32 %v1005_v33, %v860_v32  ;;  %v1669_v38 = vpop.f32.mrf.mxu0 }
 0x29b   : > { %v1725_v39 = vpop.f32.mrf.mxu1 }
 0x29c   : > { %v1468_v40 = vpack.c.bf16 %v1090_v34, %v1089_v35  ;;  %v1075_v41 = vadd.f32 %v2600_v11, %v1006_v37  ;;  %v1021_v42 = vadd.f32 %v1725_v39, %v1669_v38  ;;  %v870_v43 = vpop.f32.mrf.mxu0  ;;  %v1092_v45 = vmax.f32 %v1076_v36, 0.0 }
 0x29d   : > { %v1015_v44 = vpop.f32.mrf.mxu1 }
 0x29e   : > { %1507 = vst [vmem:[%s2569_s30 + $0x8] sm:$0xff] %v1468_v40   ;;  %v1091_v46 = vmax.f32 %v1075_v41, 0.0  ;;  %v1078_v47 = vadd.f32 %v2600_v11, %v1021_v42  ;;  %v1016_v48 = vadd.f32 %v1015_v44, %v870_v43  ;;  %v1672_v49 = vpop.f32.mrf.mxu0 }
 0x29f   : > { %v1728_v50 = vpop.f32.mrf.mxu1 }
 0x2a0   : > { %v1473_v51 = vpack.c.bf16 %v1092_v45, %v1091_v46  ;;  %v1077_v52 = vadd.f32 %v2600_v11, %v1016_v48  ;;  %v1031_v53 = vadd.f32 %v1728_v50, %v1672_v49  ;;  %v880_v54 = vpop.f32.mrf.mxu0  ;;  %v1094_v56 = vmax.f32 %v1078_v47, 0.0 }
 0x2a1   : > { %v1025_v55 = vpop.f32.mrf.mxu1 }
 0x2a2   : > { %1508 = vst [vmem:[%s2569_s30 + $0x10] sm:$0xff] %v1473_v51   ;;  %v1093_v57 = vmax.f32 %v1077_v52, 0.0  ;;  %v1080_v58 = vadd.f32 %v2600_v11, %v1031_v53  ;;  %v1026_v59 = vadd.f32 %v1025_v55, %v880_v54  ;;  %v1675_v60 = vpop.f32.mrf.mxu0 }
 0x2a3   : > { %v1731_v61 = vpop.f32.mrf.mxu1 }
 0x2a4   : > { %v1478_v62 = vpack.c.bf16 %v1094_v56, %v1093_v57  ;;  %v1079_v63 = vadd.f32 %v2600_v11, %v1026_v59  ;;  %v1041_v0 = vadd.f32 %v1731_v61, %v1675_v60  ;;  %v890_v1 = vpop.f32.mrf.mxu0  ;;  %v1096_v3 = vmax.f32 %v1080_v58, 0.0 }
 0x2a5   : > { %v1035_v2 = vpop.f32.mrf.mxu1 }
 0x2a6   : > { %1509 = vst [vmem:[%s2569_s30 + $0x18] sm:$0xff] %v1478_v62   ;;  %v1095_v4 = vmax.f32 %v1079_v63, 0.0  ;;  %v1082_v5 = vadd.f32 %v2600_v11, %v1041_v0  ;;  %v1036_v6 = vadd.f32 %v1035_v2, %v890_v1  ;;  %v1678_v7 = vpop.f32.mrf.mxu0 }
 0x2a7   : > { %v1734_v8 = vpop.f32.mrf.mxu1 }
 0x2a8   : > { %v1483_v9 = vpack.c.bf16 %v1096_v3, %v1095_v4  ;;  %v1081_v10 = vadd.f32 %v2600_v11, %v1036_v6  ;;  %v1051_v12 = vadd.f32 %v1734_v8, %v1678_v7  ;;  %v900_v13 = vpop.f32.mrf.mxu0  ;;  %v1098_v15 = vmax.f32 %v1082_v5, 0.0 }
 0x2a9   : > { %v1045_v14 = vpop.f32.mrf.mxu1 }
 0x2aa   : > { %1510 = vst [vmem:[%s2569_s30 + $0x20] sm:$0xff] %v1483_v9   ;;  %v1097_v16 = vmax.f32 %v1081_v10, 0.0  ;;  %v1084_v17 = vadd.f32 %v2600_v11, %v1051_v12  ;;  %v1046_v18 = vadd.f32 %v1045_v14, %v900_v13  ;;  %v1681_v19 = vpop.f32.mrf.mxu0 }
 0x2ab   : > { %v1737_v20 = vpop.f32.mrf.mxu1 }
 0x2ac   : > { %v1488_v21 = vpack.c.bf16 %v1098_v15, %v1097_v16  ;;  %v1083_v22 = vadd.f32 %v2600_v11, %v1046_v18  ;;  %v1061_v23 = vadd.f32 %v1737_v20, %v1681_v19  ;;  %v910_v24 = vpop.f32.mrf.mxu0  ;;  %v1100_v26 = vmax.f32 %v1084_v17, 0.0 }
 0x2ad   : > { %v1055_v25 = vpop.f32.mrf.mxu1 }
 0x2ae   : > { %1511 = vst [vmem:[%s2569_s30 + $0x28] sm:$0xff] %v1488_v21   ;;  %v1099_v27 = vmax.f32 %v1083_v22, 0.0  ;;  %v1086_v28 = vadd.f32 %v2600_v11, %v1061_v23  ;;  %v1056_v29 = vadd.f32 %v1055_v25, %v910_v24 }
 0x2b0   : > { %v1493_v30 = vpack.c.bf16 %v1100_v26, %v1099_v27  ;;  %v1085_v31 = vadd.f32 %v2600_v11, %v1056_v29  ;;  %v1102_v32 = vmax.f32 %v1086_v28, 0.0 }
 0x2b2   : > { %1512 = vst [vmem:[%s2569_s30 + $0x30] sm:$0xff] %v1493_v30   ;;  %v1101_v33 = vmax.f32 %v1085_v31, 0.0 }
 0x2b4   : > { %v1498_v34 = vpack.c.bf16 %v1102_v32, %v1101_v33 }
 0x2b6   : > { %1513 = vst [vmem:[%s2569_s30 + $0x38] sm:$0xff] %v1498_v34  }
 0x2b7 PF: > { %s2791_s16 = sld [smem:[#allocation20_spill]]  ;;  %s1197_s7 = sshll.u32 %s2569_s30, 4  ;;  %s2633_s7 = int_to_ptr.vmem [resolvable:$true] %s1197_s7 }
 0x2b8   : > { %s2792_s3 = sld [smem:[#allocation32_spill]]  ;;  %s2637_s18 = scalar_lea.sflag [#allocation5], %s343_s15 }
 0x2b9   : > { %s2070_s19 = scalar_lea.vmem %s2633_s7, 1024  ;;  %p2793_p8 = scmp.ne.s32.totalorder %s2777_s14, 0 }
 0x2ba   : > { %p2071_p11 = scmp.ne.s32.totalorder %s2633_s7, %s2070_s19  ;;  %s2238_s25 = smov [#allocation12]  }
 0x2bb   : > { %s2074_s24 = sshll.u32 %s2238_s25, 4  ;;  %s2075_s24 = int_to_ptr.vmem [resolvable:$false] %s2074_s24 }
 0x2bc   : > { %p2072_p2 = pnand %p2071_p11, %p2793_p8  ;;  %s2076_s17 = scalar_lea.vmem %s2075_s24, 2048 }
 0x2bd   : > { %s1427_s4 = sshll.u32 %s2791_s16, 10  ;;  %p2077_p6 = scmp.lt.s32.totalorder %s2633_s7, %s2075_s24 }
 0x2be   : > { %s2630_s2 = scalar_lea.hbm %s2792_s3, %s1427_s4  ;;  %p2073_p5 = pneg %p2072_p2 }
 0x2bf   : > { %p2078_p13 = scmp.lt.s32.totalorder %s2076_s17, %s2070_s19 }
 0x2c1   : > { %p2079_p1 = por %p2078_p13, %p2077_p6 }
 0x2c3   : > { %p2080_p7 = pnand %p2079_p1, %p2073_p5 }
 0x2c5   : > { %2083 = shalt.err (!%p2080_p7)
}
 0x2c6   : > { %s2084_s15 = scalar_lea.hbm %s2630_s2, 1024  ;;  %s2088_s27 = scalar_lea.hbm %s2792_s3, 2048 }
 0x2c7   : > { %p2085_p9 = scmp.ne.s32.totalorder %s2630_s2, %s2084_s15  ;;  %p2089_p3 = scmp.lt.s32.totalorder %s2630_s2, %s2792_s3 }
 0x2c8   : > { %p2090_p0 = scmp.lt.s32.totalorder %s2088_s27, %s2084_s15 }
 0x2c9   : > { %p2086_p4 = pnand %p2085_p9, %p2793_p8 }
 0x2ca   : > { %p2091_p10 = por %p2090_p0, %p2089_p3 }
 0x2cb   : > { %p2087_p12 = pneg %p2086_p4 }
 0x2cd   : > { %p2092_p11 = pnand %p2091_p10, %p2087_p12 }
 0x2cf   : > { %2095 = shalt.err (!%p2092_p11)
}
 0x2d0   : > { %s2239_s16 = smov 64   ;;  %s2240_s4 = smov 4  }
 0x2d1   : > { %1768 = dma.vmem_to_hbm [thread:$0]  (%p2793_p8), %s2633_s7, 1024, %s2630_s2, %s2637_s18, %s2239_s16, %s2239_s16, %s2240_s4  }
 0x2d2 PF: > { %p1796_p2 = scmp.ge.s32.totalorder %s2226_s10, 2  ;;  %s1212_s0 = sand.u32 1, %s2174_s21  }
 0x2d3   : > { %p2794_p5 = scmp.ne.s32.totalorder %s2778_s20, 0  ;;  %s1213_s1 = scalar_lea.sflag [#allocation5], %s1212_s0 }
 0x2d5   : > { %p1788_p6 = pnand %p1796_p2, %p2794_p5 }
 0x2d7   : > { %p1789_p13 = pneg %p1788_p6 }
 0x2d9   : > { %2169 = dma.done.wait (%p1789_p13), %s1213_s1, 1024  }
 0x2da   : > { %2171 = vsyncadd (%p1789_p13), %s1213_s1, 4294966272  ;;  %s26_s10 = sadd.s32 1, %s2226_s10   ;;  %s2796_s24 = sld [smem:[#allocation18_spill]] }
 0x2db   : > { %p2665_p1 = scmp.ge.s32.totalorder %s26_s10, 6   ;;  %s2797_s14 = sld [smem:[#allocation24_spill]] }
 0x2dc   : > { %s2798_s20 = sld [smem:[#allocation22_spill]]  ;;  %s2800_s21 = smov %s2178_s22 }
 0x2dd   : > { %s2799_s2 = sld [smem:[#allocation23_spill]]  ;;  %s2801_s22 = smov %s2182_s23 }
 0x2de   : > { %s2802_s23 = smov %s2496_s13  ;;  %s2803_s25 = smov %s2194_s26 }
 0x2df   : > { %s2805_s27 = smov %s2202_s28  ;;  %s2806_s28 = smov %s2206_s29 }
 0x2e0   : > { %s2807_s29 = smov %s2458_s12  ;;  %s2808_s30 = smov %s2218_s8 }
 0x2e1   : > { %s2804_s26 = smov %s2797_s14  ;;  %s2809_s7 = smov %s2222_s9 }
 0x2e2   : > { %s2810_s8 = smov %s2798_s20  ;;  %25 = sbr.rel (!%p2665_p1) target bundleno = 21 (0x15), region = 129 }
 0x2e3   : > { %s2811_s9 = smov %s2799_s2 }
 0x2e7   :  { %1218 = vsyncpa [#allocation4], 1 }
 0x2e8   :  { %1220 = vsyncpa [#allocation4 + $0x1], 1 }
 0x2e9   :  { %1221 = vsyncpa [#allocation7], 1 }
 0x2ea   :  { %1223 = vsyncpa [#allocation7 + $0x1], 1 }
 0x2eb   :  { %1224 = vsyncpa [#allocation10], 1 }
 0x2ec   :  { %1225 = vsyncpa [#allocation5], 1 }
 0x2ed   :  { %1227 = vsyncpa [#allocation5 + $0x1], 1 }

</bundles_post_ra>
